<compile_context>
chip_gen: v7x
topology: tpu7x:2x2x1
jax: 0.10.0
libtpu: 0.0.40
codegen_flags: <defaults>
</compile_context>

<pallas_src>
import math

import jax
import jax.numpy as jnp
from jax.experimental import pallas as pl
from jax.experimental.pallas import tpu as pltpu


# --------------------------------------------------------------------------- kernel

def _attention_energy_kernel(enc_ref, hp_ref, we_ref, v_ref, o_ref):
    """Raw attention energies for one (batch-tile, time-tile) block.

    enc_ref: (Tt, Bt, H)  encoder outputs, original seq-first layout (stream dtype)
    hp_ref : (Bt, H)      hidden @ W_h.T + bias (precomputed per batch row), f32
    we_ref : (H, H)       encoder half of attn weight, pre-transposed (contract axis 0)
    v_ref  : (1, H)       scoring vector, f32
    o_ref  : (Bt, Tt)     pre-softmax energies, f32, lane-dense over T
    """
    Tt, Bt, H = enc_ref.shape
    hp = hp_ref[...]                      # (Bt, H) f32
    vv = v_ref[...]                       # (1, H)  f32

    if Bt % 8 == 0 or Bt > 8:
        # Fused path: collapse (Tt, Bt) into the MXU M dimension -> one big matmul.
        # For Bt % 8 == 0 the reshape is a layout-free collapse of leading dims.
        x = enc_ref[...].reshape(Tt * Bt, H)
        en = jnp.dot(x, we_ref[...], preferred_element_type=jnp.float32)   # (Tt*Bt, H)
        en = jnp.maximum(en.reshape(Tt, Bt, H) + hp[None, :, :], 0.0)      # ReLU, f32 VPU
        e = jnp.sum(en * vv[None, :, :], axis=-1)                          # (Tt, Bt) lane-reduce
    else:
        # Tiny non-8-aligned batch tile (e.g. B=2): unrolled per-row matmuls, M = Tt each.
        we = we_ref[...]
        cols = []
        for b in range(Bt):
            xb = enc_ref[:, b, :]                                          # (Tt, H)
            en_b = jnp.dot(xb, we, preferred_element_type=jnp.float32)     # (Tt, H)
            en_b = jnp.maximum(en_b + hp[b:b + 1, :], 0.0)
            cols.append(jnp.sum(en_b * vv, axis=-1, keepdims=True))        # (Tt, 1)
        e = jnp.concatenate(cols, axis=1)                                  # (Tt, Bt)

    # Single transpose lands on the XLU slot; output stays lane-dense over T.
    o_ref[...] = e.T.astype(o_ref.dtype)


# --------------------------------------------------------------------------- sizing

def _tpu_vmem_bytes():
    """Physical per-core VMEM, with a conservative fallback (v7x per-TC = 64 MiB)."""
    try:
        return int(pltpu.get_tpu_info().vmem_capacity_bytes)
    except Exception:
        return 64 << 20


def _footprint_bytes(bt, tt, H, isz):
    enc = 2 * tt * bt * H * isz           # double-buffered streamed enc block
    inter = 2 * tt * bt * H * 4           # f32 matmul / ReLU intermediate (+slack)
    w = 2 * H * H * isz                   # grid-constant weight
    small = 2 * bt * H * 4 + 2 * bt * tt * 4 + (512 << 10)
    return enc + inter + w + small


def _pick_tiles(B, T, H, isz, budget):
    """Pick (batch_tile, time_tile) under a VMEM byte budget.

    batch tile: multiple of 8 dividing B (or full B when B % 8 != 0), sized so each
    strided DMA chunk of the (Tt, bt, H) block is >= 16 KiB when possible.
    time tile: largest of {full T, multiples of 128} whose working set fits the budget
    (output lane dim stays a multiple of 128 or the full T extent).
    """
    if B % 8 != 0:
        bt = B                                   # full-extent block satisfies (8,128) rule
    else:
        bt = 8
        while bt < B and (bt * H * isz < (16 << 10) or B % bt != 0):
            bt += 8
        if B % bt != 0:
            bt = B

    if T <= 128:
        cands = [T]
    else:
        cands = sorted({T, *[c for c in (2048, 1024, 512, 256, 128) if c < T]},
                       reverse=True)
    tt = cands[-1]
    for c in cands:
        if _footprint_bytes(bt, c, H, isz) <= budget:
            tt = c
            break

    # Shrink the batch tile if even the smallest time tile overflows the budget.
    while _footprint_bytes(bt, tt, H, isz) > budget and bt % 16 == 0 and bt > 8:
        bt //= 2

    # Guarantee >= 2 tiles along a "parallel" grid axis when possible (v7x dual-TC).
    if pl.cdiv(B, bt) * pl.cdiv(T, tt) < 2:
        if B >= 16 and B % 16 == 0:
            bt = B // 2
        elif T >= 256:
            tt = 128 * max(1, (T // 2) // 128)

    return bt, tt


# --------------------------------------------------------------------------- wrapper

def attention_forward(hidden, encoder_outputs, w_attn, b_attn, v,
                      *, bt=None, tt=None, stream_dtype=None):
    """Forward pass of the PyTorch `Attention` module.

    hidden: (B, H); encoder_outputs: (T, B, H); w_attn: (H, 2H); b_attn: (H,); v: (H,)
    returns (B, 1, T) softmax attention weights.

    stream_dtype: optional narrower dtype for the streamed enc block and W_e only
    (jnp.bfloat16 on v6e/v7x; jnp.float8_e4m3fn on v7x).  Accumulation, ReLU and
    softmax stay in f32.  Off by default so the default path keeps f32 semantics.
    """
    T, B, H = encoder_outputs.shape
    assert hidden.shape == (B, H)
    assert w_attn.shape == (H, 2 * H)

    f32 = jnp.float32
    # Split the Linear: concat([h, enc]) @ W.T + b == (h @ W_h.T + b) + enc @ W_e.T.
    # The hidden half is a tiny (B, H) matmul done once in the wrapper.
    h_proj = hidden.astype(f32) @ w_attn[:, :H].T.astype(f32) + b_attn.astype(f32)

    # TODO(synk): fp8 (e4m3) streaming on v7x is exposed via stream_dtype but is not
    # accuracy-gated here; keep it opt-in where bit-faithfulness matters.
    sd = encoder_outputs.dtype if stream_dtype is None else stream_dtype
    enc = encoder_outputs.astype(sd)
    w_e = w_attn[:, H:].T.astype(sd)      # pre-transposed ONCE: in-kernel contraction is K-major
    v2 = v.reshape(1, H).astype(f32)

    isz = jnp.dtype(sd).itemsize
    phys = _tpu_vmem_bytes()
    scoped = max(16 << 20, min(phys // 2, 64 << 20))     # generation-aware VMEM request
    if bt is None or tt is None:
        bt_a, tt_a = _pick_tiles(B, T, H, isz, (scoped * 3) // 4)
        bt = bt_a if bt is None else bt
        tt = tt_a if tt is None else tt
    vmem_limit = int(min(max(scoped, _footprint_bytes(bt, tt, H, isz) + (4 << 20)),
                         (phys * 7) // 8))

    nb = pl.cdiv(B, bt)
    nt = pl.cdiv(T, tt)

    energies = pl.pallas_call(
        _attention_energy_kernel,
        out_shape=jax.ShapeDtypeStruct((B, T), jnp.float32),
        grid_spec=pltpu.PrefetchScalarGridSpec(
            num_scalar_prefetch=0,
            grid=(nb, nt),
            in_specs=[
                pl.BlockSpec((tt, bt, H), lambda i, j: (j, i, 0)),   # enc, seq-first layout
                pl.BlockSpec((bt, H), lambda i, j: (i, 0)),          # h_proj (f32)
                pl.BlockSpec((H, H), lambda i, j: (0, 0)),           # W_e^T (grid-constant)
                pl.BlockSpec((1, H), lambda i, j: (0, 0)),           # v (f32)
            ],
            out_specs=pl.BlockSpec((bt, tt), lambda i, j: (i, j)),   # lane-dense over T
        ),
        compiler_params=pltpu.CompilerParams(
            dimension_semantics=("parallel", "parallel"),            # v7x dual-TC sharding
            vmem_limit_bytes=vmem_limit),
    )(enc, h_proj, w_e, v2)

    # Softmax over T on the tiny (B, T) score matrix: cheap wrapper epilogue; keeping it
    # out of the kernel needs no scratch and lets both grid axes stay "parallel".
    return jax.nn.softmax(energies, axis=1).astype(hidden.dtype)[:, None, :]   # (B, 1, T)


# --------------------------------------------------------------------------- reference

def attention_reference(hidden, encoder_outputs, w_attn, b_attn, v):
    """Pure-JAX re-implementation of the PyTorch forward, for checking."""
    T, B, H = encoder_outputs.shape
    h = jnp.broadcast_to(hidden[:, None, :], (B, T, H))
    enc = jnp.transpose(encoder_outputs, (1, 0, 2))
    cat = jnp.concatenate([h, enc], axis=2)                           # (B, T, 2H)
    energy = jax.nn.relu(jnp.einsum('btk,hk->bth', cat, w_attn) + b_attn)
    e = jnp.einsum('bth,h->bt', energy, v)                            # (B, T)
    return jax.nn.softmax(e, axis=1)[:, None, :]                      # (B, 1, T)


# --------------------------------------------------------------------------- test

if __name__ == "__main__":
    def _make(B, T, H, key):
        k_hid, k_enc, k_w, k_b, k_v = jax.random.split(key, 5)
        std_attn = 1.0 / math.sqrt(2 * H)
        w_attn = jax.random.uniform(k_w, (H, 2 * H), jnp.float32,
                                    minval=-std_attn, maxval=std_attn)
        b_attn = jax.random.uniform(k_b, (H,), jnp.float32,
                                    minval=-std_attn, maxval=std_attn)
        std_v = 1.0 / math.sqrt(H)
        v = jax.random.uniform(k_v, (H,), jnp.float32, minval=-std_v, maxval=std_v)
        hidden = jax.random.normal(k_hid, (B, H), jnp.float32)
        enc = jax.random.normal(k_enc, (T, B, H), jnp.float32)
        return hidden, enc, w_attn, b_attn, v

    key = jax.random.PRNGKey(0)
    k1, k2 = jax.random.split(key)

    # Case 1: tiny batch (B=2, T=8, H=32) -> per-row kernel path, exact f32 semantics.
    B, T, H = 2, 8, 32
    hidden, enc, w_attn, b_attn, v = _make(B, T, H, k1)
    ref = attention_reference(hidden, enc, w_attn, b_attn, v)
    out = jax.block_until_ready(attention_forward(hidden, enc, w_attn, b_attn, v))
    assert out.shape == (B, 1, T)
    assert jnp.allclose(out, ref, atol=1e-5, rtol=1e-4), "mismatch vs reference (f32, B=2)"

    # bf16-streaming option (v6e/v7x): half the streamed HBM bytes, f32 accumulation.
    out_bf = jax.block_until_ready(
        attention_forward(hidden, enc, w_attn, b_attn, v, stream_dtype=jnp.bfloat16))
    assert out_bf.shape == (B, 1, T)
    assert jnp.allclose(out_bf, ref, atol=5e-2, rtol=5e-2), "mismatch vs reference (bf16)"

    # Case 2: 8-aligned batch, T tiled into 128-wide blocks -> fused single-matmul path,
    # multi-tile (parallel, parallel) grid.
    B, T, H = 8, 256, 128
    hidden, enc, w_attn, b_attn, v = _make(B, T, H, k2)
    ref = attention_reference(hidden, enc, w_attn, b_attn, v)
    out = jax.block_until_ready(attention_forward(hidden, enc, w_attn, b_attn, v))
    assert out.shape == (B, 1, T)
    assert jnp.allclose(out, ref, atol=1e-4, rtol=1e-3), "mismatch vs reference (f32, tiled)"

    print("KERNEL_OK")
</pallas_src>

<mosaic_0001>
module attributes {stable_mosaic.version = 11 : i64} {
  func.func @_attention_energy_kernel(%arg0: i32, %arg1: i32, %arg2: memref<8x2x32xf32, #tpu.memory_space<vmem>>, %arg3: memref<2x32xf32, #tpu.memory_space<vmem>>, %arg4: memref<32x32xf32, #tpu.memory_space<vmem>>, %arg5: memref<1x32xf32, #tpu.memory_space<vmem>>, %arg6: memref<2x8xf32, #tpu.memory_space<vmem>>) attributes {dimension_semantics = [#tpu.dimension_semantics<parallel>, #tpu.dimension_semantics<parallel>], iteration_bounds = array<i64: 1, 1>, scalar_prefetch = 0 : i64, scratch_operands = 0 : i64, tpu.core_type = #tpu.core_type<tc>, window_params = [{transform_indices = @transform_0, window_bounds = array<i64: 8, 2, 32>}, {transform_indices = @transform_1, window_bounds = array<i64: 2, 32>}, {pipeline_mode = #tpu.pipeline_mode<synchronous>, transform_indices = @transform_2, window_bounds = array<i64: 32, 32>}, {pipeline_mode = #tpu.pipeline_mode<synchronous>, transform_indices = @transform_3, window_bounds = array<i64: 1, 32>}, {transform_indices = @transform_4, window_bounds = array<i64: 2, 8>}]} {
    %c0 = arith.constant 0 : index
    %c0_0 = arith.constant 0 : index
    %0 = vector.load %arg3[%c0, %c0_0] : memref<2x32xf32, #tpu.memory_space<vmem>>, vector<2x32xf32>
    %c0_1 = arith.constant 0 : index
    %c0_2 = arith.constant 0 : index
    %1 = vector.load %arg5[%c0_1, %c0_2] : memref<1x32xf32, #tpu.memory_space<vmem>>, vector<1x32xf32>
    %c0_3 = arith.constant 0 : index
    %c0_4 = arith.constant 0 : index
    %2 = vector.load %arg4[%c0_3, %c0_4] : memref<32x32xf32, #tpu.memory_space<vmem>>, vector<32x32xf32>
    %c0_5 = arith.constant 0 : index
    %c0_6 = arith.constant 0 : index
    %c0_7 = arith.constant 0 : index
    %3 = vector.load %arg2[%c0_5, %c0_6, %c0_7] : memref<8x2x32xf32, #tpu.memory_space<vmem>>, vector<8x1x32xf32>
    %4 = vector.shape_cast %3 : vector<8x1x32xf32> to vector<8x32xf32>
    %cst = arith.constant dense<0.000000e+00> : vector<8x32xf32>
    %5 = tpu.matmul %4, %2, %cst {dimension_numbers = #tpu.dot_dimension_numbers<[1], [0], [0], [1], [0, 0, 1, 1], [], []>} : vector<8x32xf32>, vector<32x32xf32>, vector<8x32xf32> -> vector<8x32xf32>
    %6 = vector.extract_strided_slice %0 {offsets = [0, 0], sizes = [1, 32], strides = [1, 1]} : vector<2x32xf32> to vector<1x32xf32>
    %7 = vector.broadcast %6 : vector<1x32xf32> to vector<8x32xf32>
    %8 = arith.addf %5, %7 : vector<8x32xf32>
    %cst_8 = arith.constant 0.000000e+00 : f32
    %9 = vector.broadcast %cst_8 : f32 to vector<8x32xf32>
    %10 = arith.maximumf %8, %9 : vector<8x32xf32>
    %11 = vector.broadcast %1 : vector<1x32xf32> to vector<8x32xf32>
    %12 = arith.mulf %10, %11 : vector<8x32xf32>
    %cst_9 = arith.constant dense<0.000000e+00> : vector<8xf32>
    %13 = vector.multi_reduction <add>, %12, %cst_9 [1] : vector<8x32xf32> to vector<8xf32>
    %14 = vector.shape_cast %13 : vector<8xf32> to vector<8x1xf32>
    %c0_10 = arith.constant 0 : index
    %c1 = arith.constant 1 : index
    %c0_11 = arith.constant 0 : index
    %15 = vector.load %arg2[%c0_10, %c1, %c0_11] : memref<8x2x32xf32, #tpu.memory_space<vmem>>, vector<8x1x32xf32>
    %16 = vector.shape_cast %15 : vector<8x1x32xf32> to vector<8x32xf32>
    %cst_12 = arith.constant dense<0.000000e+00> : vector<8x32xf32>
    %17 = tpu.matmul %16, %2, %cst_12 {dimension_numbers = #tpu.dot_dimension_numbers<[1], [0], [0], [1], [0, 0, 1, 1], [], []>} : vector<8x32xf32>, vector<32x32xf32>, vector<8x32xf32> -> vector<8x32xf32>
    %18 = vector.extract_strided_slice %0 {offsets = [1, 0], sizes = [1, 32], strides = [1, 1]} : vector<2x32xf32> to vector<1x32xf32>
    %19 = vector.broadcast %18 : vector<1x32xf32> to vector<8x32xf32>
    %20 = arith.addf %17, %19 : vector<8x32xf32>
    %cst_13 = arith.constant 0.000000e+00 : f32
    %21 = vector.broadcast %cst_13 : f32 to vector<8x32xf32>
    %22 = arith.maximumf %20, %21 : vector<8x32xf32>
    %23 = vector.broadcast %1 : vector<1x32xf32> to vector<8x32xf32>
    %24 = arith.mulf %22, %23 : vector<8x32xf32>
    %cst_14 = arith.constant dense<0.000000e+00> : vector<8xf32>
    %25 = vector.multi_reduction <add>, %24, %cst_14 [1] : vector<8x32xf32> to vector<8xf32>
    %26 = vector.shape_cast %25 : vector<8xf32> to vector<8x1xf32>
    %27 = tpu.concatenate %14, %26 in 1 : vector<8x1xf32>, vector<8x1xf32> -> vector<8x2xf32>
    %28 = tpu.transpose %27, [1, 0] : vector<8x2xf32> -> vector<2x8xf32>
    %c0_15 = arith.constant 0 : index
    %c0_16 = arith.constant 0 : index
    %29 = vector.load %arg6[%c0_15, %c0_16] : memref<2x8xf32, #tpu.memory_space<vmem>>, vector<2x8xf32>
    tpu.vector_store %arg6[%c0_15, %c0_16], %28 {strides = array<i32>} : memref<2x8xf32, #tpu.memory_space<vmem>>, vector<2x8xf32>,
    return
  }
  func.func @transform_0(%arg0: i32, %arg1: i32) -> (i32, i32, i32) {
    %c0_i32 = arith.constant 0 : i32
    %c0_i32_0 = arith.constant 0 : i32
    return %arg1, %arg0, %c0_i32 : i32, i32, i32
  }
  func.func @transform_1(%arg0: i32, %arg1: i32) -> (i32, i32) {
    %c0_i32 = arith.constant 0 : i32
    %c0_i32_0 = arith.constant 0 : i32
    return %arg0, %c0_i32 : i32, i32
  }
  func.func @transform_2(%arg0: i32, %arg1: i32) -> (i32, i32) {
    %c0_i32 = arith.constant 0 : i32
    %c0_i32_0 = arith.constant 0 : i32
    %c0_i32_1 = arith.constant 0 : i32
    return %c0_i32, %c0_i32_0 : i32, i32
  }
  func.func @transform_3(%arg0: i32, %arg1: i32) -> (i32, i32) {
    %c0_i32 = arith.constant 0 : i32
    %c0_i32_0 = arith.constant 0 : i32
    %c0_i32_1 = arith.constant 0 : i32
    return %c0_i32, %c0_i32_0 : i32, i32
  }
  func.func @transform_4(%arg0: i32, %arg1: i32) -> (i32, i32) {
    %c0_i32 = arith.constant 0 : i32
    return %arg0, %arg1 : i32, i32
  }
}

</mosaic_0001>

<bundles_post_ra>
// kernel: tpu_custom_call.1
= control target key start
LH: loop header
LB: loop body
LE: loop exit
PB: predicated region body
PF: predicated region fallthrough
CT: control target
= control target key end

     0   :  { %9 = vsyncpa [#allocation3], 0  ;;  %s564_s0 = inlined_call_operand.hbm [shape: f32[8,2,32], index: 0, kind: input, shape index: {}]   ;;  %s565_s1 = inlined_call_operand.vmem [shape: f32[2,32], index: 1, kind: input, shape index: {}]   ;;  %s566_s2 = inlined_call_operand.hbm [shape: f32[32,32], index: 2, kind: input, shape index: {}]   ;;  %s567_s3 = inlined_call_operand.vmem [shape: f32[1,32], index: 3, kind: input, shape index: {}]   ;;  %s568_s4 = inlined_call_operand.hbm [shape: f32[2,8], index: 4, kind: output, shape index: {}]  }
   0x1   :  { %10 = vsyncpa [#allocation6], 0 }
   0x2   :  { %11 = vsyncpa [#allocation4], 0  ;;  %s469_s15 = smov [#allocation2]   ;;  %s397_s19 = scalar_lea.hbm %s564_s0, 256 }
   0x3   :  { %s17_s16 = sshll.u32 %s469_s15, 4  ;;  %p398_p0 = scmp.ne.s32.totalorder %s564_s0, %s397_s19  ;;  %s18_s16 = int_to_ptr.vmem [resolvable:$true] %s17_s16 }
   0x4   :  { %p401_p1 = scmp.lt.u32.totalorder %s397_s19, %s564_s0 }
   0x6   :  { %p403_p2 = pnand %p401_p1, %p398_p0 }
   0x8   :  { %406 = shalt.err (!%p403_p2)
}
   0x9   :  { %s407_s24 = scalar_lea.vmem %s18_s16, 256  ;;  %p412_p4 = scmp.lt.s32.totalorder %s18_s16, %s18_s16 }
   0xa   :  { %p408_p3 = scmp.ne.s32.totalorder %s18_s16, %s407_s24  ;;  %p413_p5 = scmp.lt.s32.totalorder %s407_s24, %s407_s24 }
   0xc   :  { %p414_p6 = por %p413_p5, %p412_p4 }
   0xe   :  { %p415_p7 = pnand %p414_p6, %p408_p3 }
  0x10   :  { %418 = shalt.err (!%p415_p7)
}
  0x11   :  { %s470_s25 = smov 32   ;;  %s471_s26 = smov 2  }
  0x12   :  { %23 = dma.hbm_to_vmem [thread:$0]  %s564_s0, 256, %s18_s16, [#allocation3], %s470_s25, %s470_s25, %s471_s26  }
  0x13   :  { %s472_s29 = smov [#allocation5]   ;;  %s419_s7 = scalar_lea.hbm %s566_s2, 512 }
  0x14   :  { %s31_s30 = sshll.u32 %s472_s29, 4  ;;  %p420_p8 = scmp.ne.s32.totalorder %s566_s2, %s419_s7  ;;  %s32_s30 = int_to_ptr.vmem [resolvable:$true] %s31_s30 }
  0x15   :  { %p423_p9 = scmp.lt.u32.totalorder %s419_s7, %s566_s2 }
  0x17   :  { %p425_p10 = pnand %p423_p9, %p420_p8 }
  0x19   :  { %428 = shalt.err (!%p425_p10)
}
  0x1a   :  { %s429_s12 = scalar_lea.vmem %s32_s30, 512  ;;  %p434_p12 = scmp.lt.s32.totalorder %s32_s30, %s32_s30 }
  0x1b   :  { %p430_p11 = scmp.ne.s32.totalorder %s32_s30, %s429_s12  ;;  %p435_p13 = scmp.lt.s32.totalorder %s429_s12, %s429_s12 }
  0x1d   :  { %p436_p0 = por %p435_p13, %p434_p12 }
  0x1f   :  { %p437_p1 = pnand %p436_p0, %p430_p11 }
  0x21   :  { %440 = shalt.err (!%p437_p1)
}
  0x22   :  { %s473_s0 = smov 128   ;;  %s474_s13 = smov 8  }
  0x23   :  { %37 = dma.hbm_to_vmem [thread:$0]  %s566_s2, 512, %s32_s30, [#allocation6], %s473_s0, %s473_s0, %s474_s13  }
  0x24   :  { %463 = dma.done.wait [#allocation3], 256  }
  0x25   :  { %464 = vsyncadd [#allocation3], 4294967040 }
  0x26   :  { %465 = dma.done.wait [#allocation6], 512  }
  0x27   :  { %466 = vsyncadd [#allocation6], 4294966784  ;;  %v475_v0 = vmov 0.0|0.0   ;;  %vm476_vm0 = vmmov 0   ;;  %v477_v1 = vmov 0.0   ;;  %v48_v2 = vld [vmem:[#allocation5] sm:$0xff]  ;;  %v60_v52 = vlaneseq }
  0x28   :  { %375 = vmatprep.subr.bf16.mxu0 %v475_v0  ;;  %381 = vmatprep.subr.bf16.mxu1 %v475_v0  ;;  %v49_v3 = vld [vmem:[#allocation5 + $0x8] sm:$0xff]  ;;  %v50_v4 = vld [vmem:[#allocation5 + $0x10] sm:$0xff]  ;;  %v51_v6 = vld [vmem:[#allocation5 + $0x18] sm:$0xff]  ;;  %vm73_vm1 = vcmask 1041409   ;;  %vm76_vm2 = vcmask 1042434   ;;  %vm79_vm3 = vcmask 1043459  }
  0x29   :  { %361 = vmatprep.mubr.msk.f32.mxu0 %vm476_vm0, %v477_v1  ;;  %372 = vmatprep.mubr.msk.f32.mxu1 %vm476_vm0, %v477_v1  ;;  %v376_v5 = vpack.c.bf16 %v49_v3, %v48_v2  ;;  %v53_v7 = vld [vmem:[#allocation2 + $0x2] sm:$0x1]  ;;  %v54_v8 = vld [vmem:[#allocation2 + $0x4] sm:$0x1]  ;;  %v55_v9 = vld [vmem:[#allocation2 + $0x6] sm:$0x1]  ;;  %v379_v11 = vpack.c.bf16 %v51_v6, %v50_v4 }
  0x2a   :  { %v56_v10 = vld [vmem:[#allocation2 + $0x8] sm:$0x1]  ;;  %v52_v12 = vld [vmem:[#allocation2] sm:$0x1]  ;;  %v57_v13 = vld [vmem:[#allocation2 + $0xa] sm:$0x1] }
  0x2b   :  { %377 = vmatpush3.bf16.msra.mxu0 %v376_v5  ;;  %383 = vmatpush3.bf16.msra.mxu1 %v376_v5  ;;  %v58_v14 = vld [vmem:[#allocation2 + $0xc] sm:$0x1]  ;;  %v59_v15 = vld [vmem:[#allocation2 + $0xe] sm:$0x1]  ;;  %v72_v16 = vrot.slane %v53_v7, 7  ;;  %v75_v17 = vrot.slane %v54_v8, 6 }
  0x2c   :  { %378 = vmatprep.subr.bf16.mxu0 %v475_v0  ;;  %384 = vmatprep.subr.bf16.mxu1 %v475_v0  ;;  %v78_v18 = vrot.slane %v55_v9, 5  ;;  %vm82_vm4 = vcmask 1044484   ;;  %v81_v19 = vrot.slane %v56_v10, 4  ;;  %v84_v20 = vrot.slane %v57_v13, 3  ;;  %v178_v21 = vld [vmem:[#allocation2 + $0x3] sm:$0x1] }
  0x2d   :  { %vm85_vm5 = vcmask 1045509   ;;  %vm88_vm6 = vcmask 1046534   ;;  %v74_v22 = vsel %vm73_vm1, %v72_v16, %v52_v12  ;;  %v179_v23 = vld [vmem:[#allocation2 + $0x5] sm:$0x1]  ;;  %v180_v24 = vld [vmem:[#allocation2 + $0x7] sm:$0x1] }
  0x2e   :  { %v181_v25 = vld [vmem:[#allocation2 + $0x9] sm:$0x1]  ;;  %v77_v26 = vsel %vm76_vm2, %v75_v17, %v74_v22  ;;  %v87_v27 = vrot.slane %v58_v14, 2  ;;  %v90_v28 = vrot.slane %v59_v15, 1  ;;  %v177_v29 = vld [vmem:[#allocation2 + $0x1] sm:$0x1] }
  0x2f   :  { %380 = vmatpush3.bf16.msra.mxu0 %v379_v11  ;;  %386 = vmatpush3.bf16.msra.mxu1 %v379_v11  ;;  %v182_v30 = vld [vmem:[#allocation2 + $0xb] sm:$0x1]  ;;  %v80_v31 = vsel %vm79_vm3, %v78_v18, %v77_v26  ;;  %v183_v32 = vld [vmem:[#allocation2 + $0xd] sm:$0x1]  ;;  %v197_v33 = vrot.slane %v178_v21, 7  ;;  %v199_v34 = vrot.slane %v179_v23, 6 }
  0x30   :  { %v201_v35 = vrot.slane %v180_v24, 5  ;;  %v83_v36 = vsel %vm82_vm4, %v81_v19, %v80_v31  ;;  %vm91_vm7 = vcmask 1047559   ;;  %v184_v37 = vld [vmem:[#allocation2 + $0xf] sm:$0x1]  ;;  %v203_v38 = vrot.slane %v181_v25, 4 }
  0x31   :  { %v86_v39 = vsel %vm85_vm5, %v84_v20, %v83_v36  ;;  %vm93_vm8 = vcmask 261120   ;;  %v198_v40 = vsel %vm73_vm1, %v197_v33, %v177_v29  ;;  %v205_v41 = vrot.slane %v182_v30, 3  ;;  %v46_v55 = vld [vmem:[%s565_s1] sm:$0x3]  ;;  %s478_s1 = smov [#allocation7]  }
  0x32   :  { %v89_v42 = vsel %vm88_vm6, %v87_v27, %v86_v39  ;;  %v200_v43 = vsel %vm76_vm2, %v199_v34, %v198_v40  ;;  %v207_v44 = vrot.slane %v183_v32, 2  ;;  %v209_v47 = vrot.slane %v184_v37, 1  ;;  %v341_v62 = vld [vmem:[%s567_s3] ss:$0 sm:$0xff]  ;;  %s330_s3 = sshll.u32 %s478_s1, 4  ;;  %s331_s3 = int_to_ptr.vmem [resolvable:$true] %s330_s3 }
  0x33   :  { %v92_v45 = vsel %vm91_vm7, %v90_v28, %v89_v42  ;;  %v202_v46 = vsel %vm79_vm3, %v201_v35, %v200_v43  ;;  %v61_v53 = vshrl.u32 %v60_v52, 7  ;;  %vm288_vm9 = vcmask 7168   ;;  %s441_s19 = scalar_lea.vmem %s331_s3, 32  ;;  %p446_p3 = scmp.lt.s32.totalorder %s331_s3, %s331_s3 }
  0x34   :  { %362 = vmatmul.mubr.msk.f32.vlgmr.msra.gmra.mrb[0].mxu0 %vm93_vm8, %v92_v45  ;;  %v204_v48 = vsel %vm82_vm4, %v203_v38, %v202_v46  ;;  %vm322_vm10 = vcmask 58368   ;;  %p442_p2 = scmp.ne.s32.totalorder %s331_s3, %s441_s19  ;;  %p447_p4 = scmp.lt.s32.totalorder %s441_s19, %s441_s19 }
  0x35   :  { %v206_v49 = vsel %vm85_vm5, %v205_v41, %v204_v48  ;;  %v62_v54 = vsub.s32 0, %v61_v53  ;;  %v187_v57 = vsub.s32 1, %v61_v53 }
  0x36   :  { %v208_v50 = vsel %vm88_vm6, %v207_v44, %v206_v49  ;;  %p448_p5 = por %p447_p4, %p446_p3 }
  0x37   :  { %v210_v51 = vsel %vm91_vm7, %v209_v47, %v208_v50  ;;  %v63_v56 = vrot.slane %v46_v55, %v62_v54  ;;  %v188_v61 = vrot.slane %v46_v55, %v187_v57 }
  0x38   :  { %373 = vmatmul.mubr.msk.f32.vlgmr.msra.gmra.mrb[0].mxu1 %vm93_vm8, %v210_v51  ;;  %p449_p6 = pnand %p448_p5, %p442_p2 }
 0x107   :  { %v162_v58 = vpop.f32.mrb[0].mxu0 }
 0x108   :  { %v163_v59 = vadd.f32 %v162_v58, %v63_v56  ;;  %v363_v60 = vpop.f32.mrb[1].mxu0 }
 0x10a   :  { %v166_v63 = vmax.f32 %v163_v59, 0.0 }
 0x10b   :  { %v279_v0 = vpop.f32.mrb[0].mxu1 }
 0x10c   :  { %v280_v1 = vadd.f32 %v279_v0, %v188_v61  ;;  %v374_v2 = vpop.f32.mrb[1].mxu1  ;;  %v173_v3 = vmul.f32 %v341_v62, %v166_v63 }
 0x10e   :  { %v283_v4 = vmax.f32 %v280_v1, 0.0  ;;  %v174_v5 = vsel %vm93_vm8, %v173_v3, 0.0 }
 0x10f   :  { %175 = vadd.xlane.f32.xlu0 %v174_v5 }
 0x110   :  { %v284_v6 = vmul.f32 %v341_v62, %v283_v4 }
 0x112   :  { %v285_v7 = vsel %vm93_vm8, %v284_v6, 0.0 }
 0x113   :  { %286 = vadd.xlane.f32.xlu0 %v285_v7 }
 0x19c   :  { %v176_v8 = vpop.xlane.xlu0 %175 }
 0x1a0   :  { %v287_v9 = vpop.xlane.xlu0 %286 }
 0x1a1   :  { %v289_v10 = vsel %vm288_vm9, %v176_v8, %v287_v9 }
 0x1a2   :  { %290 = vxpose.xlu1.b32.start.end [1/1] (short) (narrow) %v289_v10, 8 }
 0x222   :  { %v306_v11 = vpop.trf.xlu1 }
 0x223   :  { %323 = vst.msk [vmem:[#allocation7] sm:$0x3] %vm322_vm10, %v306_v11 }
 0x224   :  { %452 = shalt.err (!%p449_p6)
}
 0x225   :  { %s453_s22 = scalar_lea.hbm %s568_s4, 32 }
 0x226   :  { %p454_p7 = scmp.ne.s32.totalorder %s568_s4, %s453_s22  ;;  %p457_p8 = scmp.lt.u32.totalorder %s453_s22, %s568_s4 }
 0x228   :  { %p459_p9 = pnand %p457_p8, %p454_p7 }
 0x22a   :  { %462 = shalt.err (!%p459_p9)
}
 0x22b   :  { %333 = dma.vmem_to_hbm [thread:$0]  %s331_s3, 32, %s568_s4, [#allocation4]  }
 0x22c   :  { %467 = dma.done.wait [#allocation4], 32  }
 0x22d   :  { %468 = vsyncadd [#allocation4], 4294967264 }
 0x22e   :  { %337 = vsyncpa [#allocation3], 1 }
 0x22f   :  { %338 = vsyncpa [#allocation6], 1 }
 0x230   :  { %339 = vsyncpa [#allocation4], 1 }

</bundles_post_ra>
